<compile_context>
chip_gen: v7x
topology: tpu7x:2x2x1
jax: 0.10.0
libtpu: 0.0.40
codegen_flags: <defaults>
</compile_context>

<pallas_src>
import jax
import jax.numpy as jnp
from jax.experimental import pallas as pl
from jax.experimental.pallas import tpu as pltpu

EPS = 1e-3


def _bn_kernel(x_ref, gb_ref, o_ref):
    # x_ref/o_ref: (N, Cb, L) f32 block — full N and L extents, Cb channels.
    # gb_ref: (2, Cb, 1) f32 — row 0 = gamma, row 1 = beta.
    n, cb, l = x_ref.shape
    inv_m = 1.0 / float(n * l)  # true element count per channel (block covers all N, L)

    # Pass 1: per-channel mean (lane reduce -> XLU, batch reduce -> VPU adds).
    x = x_ref[...]
    mean = jnp.sum(x, axis=(0, 2), keepdims=True) * inv_m            # (1, Cb, 1)

    # Pass 2: centered (two-pass) biased variance — matches PyTorch training BN.
    centered = x - mean
    var = jnp.sum(centered * centered, axis=(0, 2), keepdims=True) * inv_m
    inv_std = jax.lax.rsqrt(var + EPS)                               # (1, Cb, 1)

    gamma = gb_ref[0:1]                                              # (1, Cb, 1)
    beta = gb_ref[1:2]                                               # (1, Cb, 1)
    a = gamma * inv_std
    b = beta - mean * a

    # Pass 3: fused scale-and-shift; re-read from VMEM to bound live ranges.
    o_ref[...] = x_ref[...] * a + b


def _pick_c_block(n, c, hw, dtype_bytes=4, target_block_bytes=1 << 20):
    """Largest channel block (multiple of 8, divisor of C) fitting the budget."""
    full = n * c * hw * dtype_bytes
    if full <= target_block_bytes:
        return c  # single-shot path: whole slab in one block
    best = None
    for cb in range(8, c + 1, 8):
        if c % cb == 0 and n * cb * hw * dtype_bytes <= target_block_bytes:
            best = cb
    if best is not None:
        return best
    for cb in range(8, c + 1, 8):  # smallest legal block as a fallback
        if c % cb == 0:
            return cb
    return c


def batchnorm2d_pallas(x_nchw, gamma, beta):
    """x_nchw: (N, C, H, W) f32; gamma, beta: (C,) f32. Returns (N, C, H, W)."""
    N, C, H, W = x_nchw.shape
    HW = H * W

    x3d = x_nchw.reshape(N, C, HW)                 # free reshape from NCHW
    gb = jnp.stack([gamma, beta]).reshape(2, C, 1)  # packed affine params

    c_blk = _pick_c_block(N, C, HW)
    grid = (C // c_blk,)

    out3d = pl.pallas_call(
        _bn_kernel,
        out_shape=jax.ShapeDtypeStruct((N, C, HW), x3d.dtype),
        grid=grid,
        in_specs=[
            pl.BlockSpec((N, c_blk, HW), lambda c: (0, c, 0)),
            pl.BlockSpec((2, c_blk, 1), lambda c: (0, c, 0)),
        ],
        out_specs=pl.BlockSpec((N, c_blk, HW), lambda c: (0, c, 0)),
        compiler_params=pltpu.CompilerParams(
            dimension_semantics=("parallel",),  # channel blocks are independent
        ),
    )(x3d, gb)

    return out3d.reshape(N, C, H, W)


def _reference(x, gamma, beta):
    C = x.shape[1]
    mean = jnp.mean(x, axis=(0, 2, 3), keepdims=True)
    var = jnp.mean((x - mean) ** 2, axis=(0, 2, 3), keepdims=True)
    return (x - mean) * jax.lax.rsqrt(var + EPS) * gamma.reshape(1, C, 1, 1) \
        + beta.reshape(1, C, 1, 1)


if __name__ == "__main__":
    key = jax.random.PRNGKey(0)
    kx, kg, kb, kx2 = jax.random.split(key, 4)

    C = 176
    # PyTorch default init is gamma=1, beta=0; perturb deterministically to
    # exercise the affine path.
    gamma = 1.0 + 0.1 * jax.random.normal(kg, (C,), dtype=jnp.float32)
    beta = 0.1 * jax.random.normal(kb, (C,), dtype=jnp.float32)

    # Shape implied by the module's forward: x397 = (1, 176, 14, 14).
    x = jax.random.normal(kx, (1, C, 14, 14), dtype=jnp.float32)
    out = jax.block_until_ready(batchnorm2d_pallas(x, gamma, beta))
    assert jnp.max(jnp.abs(out - _reference(x, gamma, beta))) < 1e-4, \
        "mismatch vs reference (single-block path)"

    # Larger batch/spatial shape to exercise the channel-tiled (gridded) path.
    x2 = jax.random.normal(kx2, (4, C, 28, 28), dtype=jnp.float32)
    out2 = jax.block_until_ready(batchnorm2d_pallas(x2, gamma, beta))
    assert jnp.max(jnp.abs(out2 - _reference(x2, gamma, beta))) < 1e-4, \
        "mismatch vs reference (tiled path)"

    print("KERNEL_OK")
</pallas_src>

<mosaic_0001>
module attributes {stable_mosaic.version = 11 : i64} {
  func.func @_bn_kernel(%arg0: i32, %arg1: memref<1x176x196xf32, #tpu.memory_space<vmem>>, %arg2: memref<2x176x1xf32, #tpu.memory_space<vmem>>, %arg3: memref<1x176x196xf32, #tpu.memory_space<vmem>>) attributes {dimension_semantics = [#tpu.dimension_semantics<parallel>], iteration_bounds = array<i64: 1>, scalar_prefetch = 0 : i64, scratch_operands = 0 : i64, tpu.core_type = #tpu.core_type<tc>, window_params = [{transform_indices = @transform_0, window_bounds = array<i64: 1, 176, 196>}, {transform_indices = @transform_1, window_bounds = array<i64: 2, 176, 1>}, {transform_indices = @transform_2, window_bounds = array<i64: 1, 176, 196>}]} {
    %c0 = arith.constant 0 : index
    %c0_0 = arith.constant 0 : index
    %c0_1 = arith.constant 0 : index
    %0 = vector.load %arg1[%c0, %c0_0, %c0_1] : memref<1x176x196xf32, #tpu.memory_space<vmem>>, vector<1x176x196xf32>
    %cst = arith.constant dense<0.000000e+00> : vector<176xf32>
    %1 = vector.multi_reduction <add>, %0, %cst [0, 2] : vector<1x176x196xf32> to vector<176xf32>
    %2 = vector.shape_cast %1 : vector<176xf32> to vector<1x176x1xf32>
    %cst_2 = arith.constant 0.00510204071 : f32
    %3 = vector.broadcast %cst_2 : f32 to vector<1x176x1xf32>
    %4 = arith.mulf %2, %3 : vector<1x176x1xf32>
    %5 = vector.broadcast %4 : vector<1x176x1xf32> to vector<1x176x196xf32>
    %6 = arith.subf %0, %5 : vector<1x176x196xf32>
    %7 = arith.mulf %6, %6 : vector<1x176x196xf32>
    %cst_3 = arith.constant dense<0.000000e+00> : vector<176xf32>
    %8 = vector.multi_reduction <add>, %7, %cst_3 [0, 2] : vector<1x176x196xf32> to vector<176xf32>
    %9 = vector.shape_cast %8 : vector<176xf32> to vector<1x176x1xf32>
    %cst_4 = arith.constant 0.00510204071 : f32
    %10 = vector.broadcast %cst_4 : f32 to vector<1x176x1xf32>
    %11 = arith.mulf %9, %10 : vector<1x176x1xf32>
    %cst_5 = arith.constant 1.000000e-03 : f32
    %12 = vector.broadcast %cst_5 : f32 to vector<1x176x1xf32>
    %13 = arith.addf %11, %12 : vector<1x176x1xf32>
    %14 = math.rsqrt %13 : vector<1x176x1xf32>
    %c0_6 = arith.constant 0 : index
    %c0_7 = arith.constant 0 : index
    %c0_8 = arith.constant 0 : index
    %15 = vector.load %arg2[%c0_6, %c0_7, %c0_8] : memref<2x176x1xf32, #tpu.memory_space<vmem>>, vector<1x176x1xf32>
    %c1 = arith.constant 1 : index
    %c0_9 = arith.constant 0 : index
    %c0_10 = arith.constant 0 : index
    %16 = vector.load %arg2[%c1, %c0_9, %c0_10] : memref<2x176x1xf32, #tpu.memory_space<vmem>>, vector<1x176x1xf32>
    %17 = arith.mulf %15, %14 : vector<1x176x1xf32>
    %18 = arith.mulf %4, %17 : vector<1x176x1xf32>
    %19 = arith.subf %16, %18 : vector<1x176x1xf32>
    %c0_11 = arith.constant 0 : index
    %c0_12 = arith.constant 0 : index
    %c0_13 = arith.constant 0 : index
    %20 = vector.load %arg1[%c0_11, %c0_12, %c0_13] : memref<1x176x196xf32, #tpu.memory_space<vmem>>, vector<1x176x196xf32>
    %21 = vector.broadcast %17 : vector<1x176x1xf32> to vector<1x176x196xf32>
    %22 = arith.mulf %20, %21 : vector<1x176x196xf32>
    %23 = vector.broadcast %19 : vector<1x176x1xf32> to vector<1x176x196xf32>
    %24 = arith.addf %22, %23 : vector<1x176x196xf32>
    %c0_14 = arith.constant 0 : index
    %c0_15 = arith.constant 0 : index
    %c0_16 = arith.constant 0 : index
    %25 = vector.load %arg3[%c0_14, %c0_15, %c0_16] : memref<1x176x196xf32, #tpu.memory_space<vmem>>, vector<1x176x196xf32>
    tpu.vector_store %arg3[%c0_14, %c0_15, %c0_16], %24 {strides = array<i32>} : memref<1x176x196xf32, #tpu.memory_space<vmem>>, vector<1x176x196xf32>,
    return
  }
  func.func @transform_0(%arg0: i32) -> (i32, i32, i32) {
    %c0_i32 = arith.constant 0 : i32
    %c0_i32_0 = arith.constant 0 : i32
    %c0_i32_1 = arith.constant 0 : i32
    return %c0_i32, %arg0, %c0_i32_0 : i32, i32, i32
  }
  func.func @transform_1(%arg0: i32) -> (i32, i32, i32) {
    %c0_i32 = arith.constant 0 : i32
    %c0_i32_0 = arith.constant 0 : i32
    %c0_i32_1 = arith.constant 0 : i32
    return %c0_i32, %arg0, %c0_i32_0 : i32, i32, i32
  }
  func.func @transform_2(%arg0: i32) -> (i32, i32, i32) {
    %c0_i32 = arith.constant 0 : i32
    %c0_i32_0 = arith.constant 0 : i32
    %c0_i32_1 = arith.constant 0 : i32
    return %c0_i32, %arg0, %c0_i32_0 : i32, i32, i32
  }
}

</mosaic_0001>

<bundles_post_ra>
// kernel: tpu_custom_call.1
= control target key start
LH: loop header
LB: loop body
LE: loop exit
PB: predicated region body
PF: predicated region fallthrough
CT: control target
= control target key end

     0   :  { %vm56_vm0 = vcmask 556032   ;;  %s1963_s0 = inlined_call_operand.vmem [shape: f32[1,176,196], index: 0, kind: input, shape index: {}]   ;;  %s1964_s1 = inlined_call_operand.vmem [shape: f32[2,176,1], index: 1, kind: input, shape index: {}]   ;;  %s1965_s2 = inlined_call_operand.hbm [shape: f32[1,176,196], index: 2, kind: output, shape index: {}]  }
   0x1   :  { %v1050_v0 = vld [vmem:[%s1963_s0] sm:$0xff]  ;;  %v1055_v1 = vld [vmem:[%s1963_s0 + $0x8] sm:$0xff]  ;;  %v1072_v5 = vld [vmem:[%s1963_s0 + $0x10] sm:$0xff] }
   0x2   :  { %v1060_v2 = vld [vmem:[%s1963_s0 + $0x20] sm:$0xff]  ;;  %v57_v3 = vsel %vm56_vm0, %v1055_v1, 0.0  ;;  %v1067_v4 = vld [vmem:[%s1963_s0 + $0x28] sm:$0xff]  ;;  %v1077_v6 = vld [vmem:[%s1963_s0 + $0x18] sm:$0xff] }
   0x3   :  { %v58_v7 = vadd.f32 %v57_v3, %v1050_v0  ;;  %v65_v8 = vsel %vm56_vm0, %v1067_v4, 0.0  ;;  %v61_v9 = vsel %vm56_vm0, %v1077_v6, 0.0  ;;  %v1087_v10 = vld [vmem:[%s1963_s0 + $0x30] sm:$0xff]  ;;  %v1092_v11 = vld [vmem:[%s1963_s0 + $0x38] sm:$0xff]  ;;  %v1100_v14 = vld [vmem:[%s1963_s0 + $0x48] sm:$0xff] }
   0x4   :  { %v66_v12 = vadd.f32 %v65_v8, %v1060_v2  ;;  %v69_v13 = vsel %vm56_vm0, %v1092_v11, 0.0  ;;  %v1105_v15 = vld [vmem:[%s1963_s0 + $0x58] sm:$0xff]  ;;  %v62_v16 = vadd.f32 %v61_v9, %v1072_v5  ;;  %v1112_v18 = vld [vmem:[%s1963_s0 + $0x40] sm:$0xff]  ;;  %v73_v19 = vsel %vm56_vm0, %v1100_v14, 0.0  ;;  %v1119_v20 = vld [vmem:[%s1963_s0 + $0x50] sm:$0xff] }
   0x5   :  { %59 = vadd.xlane.f32.xlu0 %v58_v7  ;;  %v70_v17 = vadd.f32 %v69_v13, %v1087_v10  ;;  %v77_v21 = vsel %vm56_vm0, %v1105_v15, 0.0  ;;  %v1126_v22 = vld [vmem:[%s1963_s0 + $0x68] sm:$0xff]  ;;  %v1131_v23 = vld [vmem:[%s1963_s0 + $0x78] sm:$0xff]  ;;  %v74_v24 = vadd.f32 %v73_v19, %v1112_v18  ;;  %v1138_v26 = vld [vmem:[%s1963_s0 + $0x60] sm:$0xff] }
   0x6   :  { %67 = vadd.xlane.f32.xlu1 %v66_v12  ;;  %v78_v25 = vadd.f32 %v77_v21, %v1119_v20  ;;  %v81_v27 = vsel %vm56_vm0, %v1126_v22, 0.0  ;;  %v1145_v28 = vld [vmem:[%s1963_s0 + $0x70] sm:$0xff]  ;;  %v85_v29 = vsel %vm56_vm0, %v1131_v23, 0.0  ;;  %v1152_v30 = vld [vmem:[%s1963_s0 + $0x88] sm:$0xff]  ;;  %v1157_v31 = vld [vmem:[%s1963_s0 + $0x98] sm:$0xff] }
   0x7   :  { %v82_v32 = vadd.f32 %v81_v27, %v1138_v26  ;;  %v86_v33 = vadd.f32 %v85_v29, %v1145_v28  ;;  %v1164_v34 = vld [vmem:[%s1963_s0 + $0x80] sm:$0xff]  ;;  %v89_v35 = vsel %vm56_vm0, %v1152_v30, 0.0  ;;  %v1171_v36 = vld [vmem:[%s1963_s0 + $0x90] sm:$0xff]  ;;  %v93_v37 = vsel %vm56_vm0, %v1157_v31, 0.0  ;;  %v1178_v38 = vld [vmem:[%s1963_s0 + $0xa8] sm:$0xff] }
   0x9   :  { %63 = vadd.xlane.f32.xlu0 %v62_v16 }
   0xa   :  { %71 = vadd.xlane.f32.xlu1 %v70_v17 }
   0xd   :  { %75 = vadd.xlane.f32.xlu0 %v74_v24 }
   0xe   :  { %79 = vadd.xlane.f32.xlu1 %v78_v25 }
   0xf   :  { %7 = vsyncpa [#allocation3], 0  ;;  %v1183_v39 = vld [vmem:[%s1963_s0 + $0xb8] sm:$0xff]  ;;  %v90_v40 = vadd.f32 %v89_v35, %v1164_v34  ;;  %v94_v41 = vadd.f32 %v93_v37, %v1171_v36  ;;  %v1190_v42 = vld [vmem:[%s1963_s0 + $0xa0] sm:$0xff]  ;;  %v97_v43 = vsel %vm56_vm0, %v1178_v38, 0.0  ;;  %s1029_s14 = smov [#allocation2]  }
  0x10   :  { %v1197_v44 = vld [vmem:[%s1963_s0 + $0xb0] sm:$0xff]  ;;  %v101_v45 = vsel %vm56_vm0, %v1183_v39, 0.0  ;;  %v1204_v46 = vld [vmem:[%s1963_s0 + $0xc8] sm:$0xff]  ;;  %v1209_v47 = vld [vmem:[%s1963_s0 + $0xd8] sm:$0xff]  ;;  %v98_v48 = vadd.f32 %v97_v43, %v1190_v42  ;;  %s877_s15 = sshll.u32 %s1029_s14, 4  ;;  %s878_s15 = int_to_ptr.vmem [resolvable:$true] %s877_s15 }
  0x11   :  { %83 = vadd.xlane.f32.xlu0 %v82_v32  ;;  %v102_v49 = vadd.f32 %v101_v45, %v1197_v44  ;;  %v1216_v50 = vld [vmem:[%s1963_s0 + $0xc0] sm:$0xff]  ;;  %v105_v51 = vsel %vm56_vm0, %v1204_v46, 0.0  ;;  %v1223_v52 = vld [vmem:[%s1963_s0 + $0xd0] sm:$0xff]  ;;  %v109_v53 = vsel %vm56_vm0, %v1209_v47, 0.0  ;;  %v1230_v54 = vld [vmem:[%s1963_s0 + $0xe8] sm:$0xff]  ;;  %s1004_s19 = scalar_lea.vmem %s878_s15, 5632  ;;  %p1009_p1 = scmp.lt.s32.totalorder %s878_s15, %s878_s15 }
  0x12   :  { %87 = vadd.xlane.f32.xlu1 %v86_v33  ;;  %v1235_v55 = vld [vmem:[%s1963_s0 + $0xf8] sm:$0xff]  ;;  %v106_v56 = vadd.f32 %v105_v51, %v1216_v50  ;;  %v110_v57 = vadd.f32 %v109_v53, %v1223_v52  ;;  %v1242_v58 = vld [vmem:[%s1963_s0 + $0xe0] sm:$0xff]  ;;  %v113_v59 = vsel %vm56_vm0, %v1230_v54, 0.0  ;;  %v1249_v60 = vld [vmem:[%s1963_s0 + $0xf0] sm:$0xff]  ;;  %p1005_p0 = scmp.ne.s32.totalorder %s878_s15, %s1004_s19  ;;  %p1010_p2 = scmp.lt.s32.totalorder %s1004_s19, %s1004_s19 }
  0x13   :  { %v117_v61 = vsel %vm56_vm0, %v1235_v55, 0.0  ;;  %v1256_v62 = vld [vmem:[%s1963_s0 + $0x108] sm:$0xff]  ;;  %v1261_v63 = vld [vmem:[%s1963_s0 + $0x118] sm:$0xff]  ;;  %v114_v3 = vadd.f32 %v113_v59, %v1242_v58  ;;  %v1268_v8 = vld [vmem:[%s1963_s0 + $0x100] sm:$0xff] }
  0x14   :  { %v118_v7 = vadd.f32 %v117_v61, %v1249_v60  ;;  %v121_v9 = vsel %vm56_vm0, %v1256_v62, 0.0  ;;  %v1275_v12 = vld [vmem:[%s1963_s0 + $0x110] sm:$0xff]  ;;  %v125_v13 = vsel %vm56_vm0, %v1261_v63, 0.0  ;;  %v1282_v16 = vld [vmem:[%s1963_s0 + $0x128] sm:$0xff]  ;;  %v1287_v17 = vld [vmem:[%s1963_s0 + $0x138] sm:$0xff]  ;;  %p1011_p3 = por %p1010_p2, %p1009_p1 }
  0x15   :  { %91 = vadd.xlane.f32.xlu0 %v90_v40  ;;  %v122_v19 = vadd.f32 %v121_v9, %v1268_v8  ;;  %v126_v21 = vadd.f32 %v125_v13, %v1275_v12  ;;  %v1294_v24 = vld [vmem:[%s1963_s0 + $0x120] sm:$0xff]  ;;  %v129_v25 = vsel %vm56_vm0, %v1282_v16, 0.0  ;;  %v1301_v27 = vld [vmem:[%s1963_s0 + $0x130] sm:$0xff]  ;;  %v133_v29 = vsel %vm56_vm0, %v1287_v17, 0.0  ;;  %v1308_v32 = vld [vmem:[%s1963_s0 + $0x148] sm:$0xff] }
  0x16   :  { %95 = vadd.xlane.f32.xlu1 %v94_v41  ;;  %v1313_v33 = vld [vmem:[%s1963_s0 + $0x158] sm:$0xff]  ;;  %v130_v35 = vadd.f32 %v129_v25, %v1294_v24  ;;  %v134_v37 = vadd.f32 %v133_v29, %v1301_v27  ;;  %v1320_v40 = vld [vmem:[%s1963_s0 + $0x140] sm:$0xff]  ;;  %v137_v41 = vsel %vm56_vm0, %v1308_v32, 0.0  ;;  %v1327_v43 = vld [vmem:[%s1963_s0 + $0x150] sm:$0xff]  ;;  %p1012_p4 = pnand %p1011_p3, %p1005_p0 }
  0x17   :  { %v141_v45 = vsel %vm56_vm0, %v1313_v33, 0.0 }
  0x19   :  { %99 = vadd.xlane.f32.xlu0 %v98_v48  ;;  %v138_v48 = vadd.f32 %v137_v41, %v1320_v40 }
  0x1a   :  { %103 = vadd.xlane.f32.xlu1 %v102_v49  ;;  %v142_v49 = vadd.f32 %v141_v45, %v1327_v43 }
  0x1d   :  { %107 = vadd.xlane.f32.xlu0 %v106_v56 }
  0x1e   :  { %111 = vadd.xlane.f32.xlu1 %v110_v57 }
  0x21   :  { %115 = vadd.xlane.f32.xlu0 %v114_v3 }
  0x22   :  { %119 = vadd.xlane.f32.xlu1 %v118_v7 }
  0x25   :  { %123 = vadd.xlane.f32.xlu0 %v122_v19 }
  0x26   :  { %127 = vadd.xlane.f32.xlu1 %v126_v21 }
  0x29   :  { %131 = vadd.xlane.f32.xlu0 %v130_v35 }
  0x2a   :  { %135 = vadd.xlane.f32.xlu1 %v134_v37 }
  0x2d   :  { %139 = vadd.xlane.f32.xlu0 %v138_v48 }
  0x2e   :  { %143 = vadd.xlane.f32.xlu1 %v142_v49 }
  0x92   :  { %v60_v51 = vpop.xlane.xlu0 %59 }
  0x93   :  { %v1333_v53 = vmul.f32 0.0051020407, %v60_v51  ;;  %v68_v56 = vpop.xlane.xlu1 %67 }
  0x94   :  { %v1335_v57 = vmul.f32 0.0051020407, %v68_v56 }
  0x95   :  { %v167_v59 = vsub.f32 %v1050_v0, %v1333_v53  ;;  %v168_v61 = vsub.f32 %v1055_v1, %v1333_v53 }
  0x96   :  { %v64_v3 = vpop.xlane.xlu0 %63  ;;  %v171_v7 = vsub.f32 %v1060_v2, %v1335_v57  ;;  %v172_v9 = vsub.f32 %v1067_v4, %v1335_v57 }
  0x97   :  { %v1345_v13 = vmul.f32 0.0051020407, %v64_v3  ;;  %v72_v19 = vpop.xlane.xlu1 %71  ;;  %v211_v21 = vmul.f32 %v167_v59, %v167_v59  ;;  %v212_v25 = vmul.f32 %v168_v61, %v168_v61 }
  0x98   :  { %v1347_v29 = vmul.f32 0.0051020407, %v72_v19  ;;  %v215_v35 = vmul.f32 %v171_v7, %v171_v7  ;;  %v216_v37 = vmul.f32 %v172_v9, %v172_v9 }
  0x99   :  { %v255_v0 = vsel %vm56_vm0, %v212_v25, 0.0  ;;  %v169_v1 = vsub.f32 %v1072_v5, %v1345_v13  ;;  %v170_v2 = vsub.f32 %v1077_v6, %v1345_v13 }
  0x9a   :  { %v76_v41 = vpop.xlane.xlu0 %75  ;;  %v256_v45 = vadd.f32 %v255_v0, %v211_v21  ;;  %v263_v4 = vsel %vm56_vm0, %v216_v37, 0.0  ;;  %v173_v48 = vsub.f32 %v1087_v10, %v1347_v29  ;;  %v174_v49 = vsub.f32 %v1092_v11, %v1347_v29 }
  0x9b   :  { %v1359_v51 = vmul.f32 0.0051020407, %v76_v41  ;;  %v80_v56 = vpop.xlane.xlu1 %79  ;;  %v213_v59 = vmul.f32 %v169_v1, %v169_v1  ;;  %v214_v61 = vmul.f32 %v170_v2, %v170_v2  ;;  %v264_v3 = vadd.f32 %v263_v4, %v215_v35 }
  0x9c   :  { %257 = vadd.xlane.f32.xlu0 %v256_v45  ;;  %v1361_v5 = vmul.f32 0.0051020407, %v80_v56  ;;  %v217_v6 = vmul.f32 %v173_v48, %v173_v48  ;;  %v218_v7 = vmul.f32 %v174_v49, %v174_v49 }
  0x9d   :  { %v259_v9 = vsel %vm56_vm0, %v214_v61, 0.0  ;;  %v175_v19 = vsub.f32 %v1112_v18, %v1359_v51  ;;  %v176_v10 = vsub.f32 %v1100_v14, %v1359_v51 }
  0x9e   :  { %v84_v11 = vpop.xlane.xlu0 %83  ;;  %v260_v21 = vadd.f32 %v259_v9, %v213_v59  ;;  %v267_v25 = vsel %vm56_vm0, %v218_v7, 0.0  ;;  %v177_v37 = vsub.f32 %v1119_v20, %v1361_v5  ;;  %v178_v35 = vsub.f32 %v1105_v15, %v1361_v5 }
  0x9f   :  { %v1373_v0 = vmul.f32 0.0051020407, %v84_v11  ;;  %v88_v1 = vpop.xlane.xlu1 %87  ;;  %v219_v2 = vmul.f32 %v175_v19, %v175_v19  ;;  %v220_v41 = vmul.f32 %v176_v10, %v176_v10  ;;  %v268_v14 = vadd.f32 %v267_v25, %v217_v6 }
  0xa0   :  { %265 = vadd.xlane.f32.xlu0 %v264_v3  ;;  %261 = vadd.xlane.f32.xlu1 %v260_v21  ;;  %v1375_v18 = vmul.f32 0.0051020407, %v88_v1  ;;  %v221_v45 = vmul.f32 %v177_v37, %v177_v37  ;;  %v222_v4 = vmul.f32 %v178_v35, %v178_v35 }
  0xa1   :  { %v271_v48 = vsel %vm56_vm0, %v220_v41, 0.0  ;;  %v179_v20 = vsub.f32 %v1138_v26, %v1373_v0  ;;  %v180_v15 = vsub.f32 %v1126_v22, %v1373_v0 }
  0xa2   :  { %v92_v49 = vpop.xlane.xlu0 %91  ;;  %v272_v56 = vadd.f32 %v271_v48, %v219_v2  ;;  %v275_v59 = vsel %vm56_vm0, %v222_v4, 0.0  ;;  %v181_v61 = vsub.f32 %v1145_v28, %v1375_v18  ;;  %v182_v3 = vsub.f32 %v1131_v23, %v1375_v18 }
  0xa3   :  { %v1387_v6 = vmul.f32 0.0051020407, %v92_v49  ;;  %v96_v7 = vpop.xlane.xlu1 %95  ;;  %v223_v9 = vmul.f32 %v179_v20, %v179_v20  ;;  %v224_v19 = vmul.f32 %v180_v15, %v180_v15  ;;  %v276_v22 = vadd.f32 %v275_v59, %v221_v45 }
  0xa4   :  { %269 = vadd.xlane.f32.xlu1 %v268_v14  ;;  %273 = vadd.xlane.f32.xlu0 %v272_v56  ;;  %v1389_v26 = vmul.f32 0.0051020407, %v96_v7  ;;  %v225_v10 = vmul.f32 %v181_v61, %v181_v61  ;;  %v226_v11 = vmul.f32 %v182_v3, %v182_v3 }
  0xa5   :  { %v279_v21 = vsel %vm56_vm0, %v224_v19, 0.0  ;;  %v183_v28 = vsub.f32 %v1164_v34, %v1387_v6  ;;  %v184_v23 = vsub.f32 %v1152_v30, %v1387_v6 }
  0xa6   :  { %v100_v25 = vpop.xlane.xlu0 %99  ;;  %v280_v37 = vadd.f32 %v279_v21, %v223_v9  ;;  %v283_v35 = vsel %vm56_vm0, %v226_v11, 0.0  ;;  %v185_v1 = vsub.f32 %v1171_v36, %v1389_v26  ;;  %v186_v2 = vsub.f32 %v1157_v31, %v1389_v26 }
  0xa7   :  { %v1401_v41 = vmul.f32 0.0051020407, %v100_v25  ;;  %v104_v14 = vpop.xlane.xlu1 %103  ;;  %v227_v45 = vmul.f32 %v183_v28, %v183_v28  ;;  %v228_v4 = vmul.f32 %v184_v23, %v184_v23  ;;  %v284_v30 = vadd.f32 %v283_v35, %v225_v10 }
  0xa8   :  { %277 = vadd.xlane.f32.xlu1 %v276_v22  ;;  %281 = vadd.xlane.f32.xlu0 %v280_v37  ;;  %v1403_v34 = vmul.f32 0.0051020407, %v104_v14  ;;  %v229_v48 = vmul.f32 %v185_v1, %v185_v1  ;;  %v230_v20 = vmul.f32 %v186_v2, %v186_v2 }
  0xa9   :  { %v287_v15 = vsel %vm56_vm0, %v228_v4, 0.0  ;;  %v187_v36 = vsub.f32 %v1190_v42, %v1401_v41  ;;  %v188_v31 = vsub.f32 %v1178_v38, %v1401_v41 }
  0xaa   :  { %v108_v49 = vpop.xlane.xlu0 %107  ;;  %v288_v56 = vadd.f32 %v287_v15, %v227_v45  ;;  %v291_v59 = vsel %vm56_vm0, %v230_v20, 0.0  ;;  %v189_v61 = vsub.f32 %v1197_v44, %v1403_v34  ;;  %v190_v3 = vsub.f32 %v1183_v39, %v1403_v34 }
  0xab   :  { %v1415_v7 = vmul.f32 0.0051020407, %v108_v49  ;;  %v112_v9 = vpop.xlane.xlu1 %111  ;;  %v231_v19 = vmul.f32 %v187_v36, %v187_v36  ;;  %v232_v22 = vmul.f32 %v188_v31, %v188_v31  ;;  %v292_v38 = vadd.f32 %v291_v59, %v229_v48 }
  0xac   :  { %285 = vadd.xlane.f32.xlu1 %v284_v30  ;;  %289 = vadd.xlane.f32.xlu0 %v288_v56  ;;  %v1417_v42 = vmul.f32 0.0051020407, %v112_v9  ;;  %v233_v10 = vmul.f32 %v189_v61, %v189_v61  ;;  %v234_v11 = vmul.f32 %v190_v3, %v190_v3 }
  0xad   :  { %v295_v21 = vsel %vm56_vm0, %v232_v22, 0.0  ;;  %v191_v44 = vsub.f32 %v1216_v50, %v1415_v7  ;;  %v192_v39 = vsub.f32 %v1204_v46, %v1415_v7 }
  0xae   :  { %v116_v28 = vpop.xlane.xlu0 %115  ;;  %v296_v23 = vadd.f32 %v295_v21, %v231_v19  ;;  %v299_v25 = vsel %vm56_vm0, %v234_v11, 0.0  ;;  %v193_v37 = vsub.f32 %v1223_v52, %v1417_v42  ;;  %v194_v35 = vsub.f32 %v1209_v47, %v1417_v42 }
  0xaf   :  { %v1429_v1 = vmul.f32 0.0051020407, %v116_v28  ;;  %v120_v2 = vpop.xlane.xlu1 %119  ;;  %v235_v14 = vmul.f32 %v191_v44, %v191_v44  ;;  %v236_v45 = vmul.f32 %v192_v39, %v192_v39  ;;  %v300_v46 = vadd.f32 %v299_v25, %v233_v10 }
  0xb0   :  { %293 = vadd.xlane.f32.xlu1 %v292_v38  ;;  %297 = vadd.xlane.f32.xlu0 %v296_v23  ;;  %v1431_v50 = vmul.f32 0.0051020407, %v120_v2  ;;  %v237_v4 = vmul.f32 %v193_v37, %v193_v37  ;;  %v238_v30 = vmul.f32 %v194_v35, %v194_v35 }
  0xb1   :  { %v303_v48 = vsel %vm56_vm0, %v236_v45, 0.0  ;;  %v195_v52 = vsub.f32 %v1242_v58, %v1429_v1  ;;  %v196_v47 = vsub.f32 %v1230_v54, %v1429_v1 }
  0xb2   :  { %v124_v20 = vpop.xlane.xlu0 %123  ;;  %v304_v15 = vadd.f32 %v303_v48, %v235_v14  ;;  %v307_v36 = vsel %vm56_vm0, %v238_v30, 0.0  ;;  %v197_v31 = vsub.f32 %v1249_v60, %v1431_v50  ;;  %v198_v49 = vsub.f32 %v1235_v55, %v1431_v50 }
  0xb3   :  { %v1443_v56 = vmul.f32 0.0051020407, %v124_v20  ;;  %v128_v59 = vpop.xlane.xlu1 %127  ;;  %v239_v61 = vmul.f32 %v195_v52, %v195_v52  ;;  %v240_v3 = vmul.f32 %v196_v47, %v196_v47  ;;  %v308_v54 = vadd.f32 %v307_v36, %v237_v4 }
  0xb4   :  { %301 = vadd.xlane.f32.xlu1 %v300_v46  ;;  %305 = vadd.xlane.f32.xlu0 %v304_v15  ;;  %v1445_v58 = vmul.f32 0.0051020407, %v128_v59  ;;  %v241_v9 = vmul.f32 %v197_v31, %v197_v31  ;;  %v242_v19 = vmul.f32 %v198_v49, %v198_v49  ;;  %v1028_v49 = vmov 0  }
  0xb5   :  { %v311_v22 = vsel %vm56_vm0, %v240_v3, 0.0  ;;  %v199_v60 = vsub.f32 %v1268_v8, %v1443_v56  ;;  %v200_v55 = vsub.f32 %v1256_v62, %v1443_v56  ;;  %914 = vset.pattern.permute.xlu0 %v1028_v49  ;;  %915 = vset.pattern.permute.xlu1 %v1028_v49 }
  0xb6   :  { %v132_v38 = vpop.xlane.xlu0 %131  ;;  %v312_v10 = vadd.f32 %v311_v22, %v239_v61  ;;  %v315_v11 = vsel %vm56_vm0, %v242_v19, 0.0  ;;  %v201_v21 = vsub.f32 %v1275_v12, %v1445_v58  ;;  %v202_v44 = vsub.f32 %v1261_v63, %v1445_v58 }
  0xb7   :  { %v1457_v39 = vmul.f32 0.0051020407, %v132_v38  ;;  %v136_v28 = vpop.xlane.xlu1 %135  ;;  %v243_v23 = vmul.f32 %v199_v60, %v199_v60  ;;  %v244_v25 = vmul.f32 %v200_v55, %v200_v55  ;;  %v316_v62 = vadd.f32 %v315_v11, %v241_v9 }
  0xb8   :  { %309 = vadd.xlane.f32.xlu1 %v308_v54  ;;  %313 = vadd.xlane.f32.xlu0 %v312_v10  ;;  %v1459_v8 = vmul.f32 0.0051020407, %v136_v28  ;;  %v245_v37 = vmul.f32 %v201_v21, %v201_v21  ;;  %v246_v35 = vmul.f32 %v202_v44, %v202_v44 }
  0xb9   :  { %v319_v2 = vsel %vm56_vm0, %v244_v25, 0.0  ;;  %v203_v12 = vsub.f32 %v1294_v24, %v1457_v39  ;;  %v204_v63 = vsub.f32 %v1282_v16, %v1457_v39 }
  0xba   :  { %v140_v14 = vpop.xlane.xlu0 %139  ;;  %v320_v45 = vadd.f32 %v319_v2, %v243_v23  ;;  %v323_v46 = vsel %vm56_vm0, %v246_v35, 0.0  ;;  %v205_v4 = vsub.f32 %v1301_v27, %v1459_v8  ;;  %v206_v30 = vsub.f32 %v1287_v17, %v1459_v8 }
  0xbb   :  { %v1471_v48 = vmul.f32 0.0051020407, %v140_v14  ;;  %v144_v52 = vpop.xlane.xlu1 %143  ;;  %v324_v47 = vadd.f32 %v323_v46, %v245_v37  ;;  %v247_v20 = vmul.f32 %v203_v12, %v203_v12  ;;  %v248_v15 = vmul.f32 %v204_v63, %v204_v63  ;;  %v409_v46 = vld [vmem:[%s1964_s1] sm:$0xff] }
  0xbc   :  { %317 = vadd.xlane.f32.xlu1 %v316_v62  ;;  %321 = vadd.xlane.f32.xlu0 %v320_v45  ;;  %v1473_v24 = vmul.f32 0.0051020407, %v144_v52  ;;  %v249_v16 = vmul.f32 %v205_v4, %v205_v4  ;;  %v250_v36 = vmul.f32 %v206_v30, %v206_v30 }
  0xbd   :  { %v327_v31 = vsel %vm56_vm0, %v248_v15, 0.0  ;;  %v207_v27 = vsub.f32 %v1320_v40, %v1471_v48  ;;  %v208_v17 = vsub.f32 %v1308_v32, %v1471_v48 }
  0xbe   :  { %v328_v59 = vadd.f32 %v327_v31, %v247_v20  ;;  %v331_v61 = vsel %vm56_vm0, %v250_v36, 0.0  ;;  %v209_v3 = vsub.f32 %v1327_v43, %v1473_v24  ;;  %v210_v54 = vsub.f32 %v1313_v33, %v1473_v24 }
  0xbf   :  { %v251_v9 = vmul.f32 %v207_v27, %v207_v27  ;;  %v252_v19 = vmul.f32 %v208_v17, %v208_v17  ;;  %v332_v40 = vadd.f32 %v331_v61, %v249_v16  ;;  %v410_v16 = vld [vmem:[%s1964_s1 + $0x8] sm:$0xff] }
  0xc0   :  { %325 = vadd.xlane.f32.xlu1 %v324_v47  ;;  %329 = vadd.xlane.f32.xlu0 %v328_v59  ;;  %v253_v22 = vmul.f32 %v209_v3, %v209_v3  ;;  %v254_v60 = vmul.f32 %v210_v54, %v210_v54  ;;  %v411_v54 = vld [vmem:[%s1964_s1 + $0x10] sm:$0xff] }
  0xc1   :  { %v335_v32 = vsel %vm56_vm0, %v252_v19, 0.0 }
  0xc2   :  { %v336_v55 = vadd.f32 %v335_v32, %v251_v9  ;;  %v339_v38 = vsel %vm56_vm0, %v254_v60, 0.0 }
  0xc3   :  { %v340_v10 = vadd.f32 %v339_v38, %v253_v22 }
  0xc4   :  { %333 = vadd.xlane.f32.xlu1 %v332_v40  ;;  %337 = vadd.xlane.f32.xlu0 %v336_v55 }
  0xc8   :  { %341 = vadd.xlane.f32.xlu1 %v340_v10  ;;  %v412_v10 = vld [vmem:[%s1964_s1 + $0x18] sm:$0xff] }
 0x129   :  { %v258_v43 = vpop.xlane.xlu0 %257 }
 0x12a   :  { %v343_v11 = vmul.f32 0.0051020407, %v258_v43 }
 0x12c   :  { %v365_v21 = vadd.f32 0.001, %v343_v11 }
 0x12d   :  { %v262_v33 = vpop.xlane.xlu1 %261  ;;  %v266_v44 = vpop.xlane.xlu0 %265 }
 0x12e   :  { %916 = vrsqrt.f32 %v365_v21  ;;  %v344_v28 = vmul.f32 0.0051020407, %v262_v33  ;;  %v345_v23 = vmul.f32 0.0051020407, %v266_v44 }
 0x130   :  { %v366_v25 = vadd.f32 0.001, %v344_v28  ;;  %v367_v62 = vadd.f32 0.001, %v345_v23 }
 0x131   :  { %v270_v37 = vpop.xlane.xlu1 %269  ;;  %v274_v35 = vpop.xlane.xlu0 %273 }
 0x132   :  { %918 = vrsqrt.f32 %v366_v25  ;;  %v346_v2 = vmul.f32 0.0051020407, %v270_v37  ;;  %v347_v63 = vmul.f32 0.0051020407, %v274_v35  ;;  %v413_v25 = vld [vmem:[%s1964_s1 + $0x20] sm:$0xff] }
 0x133   :  { %920 = vrsqrt.f32 %v367_v62 }
 0x134   :  { %v368_v12 = vadd.f32 0.001, %v346_v2  ;;  %v369_v30 = vadd.f32 0.001, %v347_v63 }
 0x135   :  { %v278_v14 = vpop.xlane.xlu1 %277  ;;  %v282_v45 = vpop.xlane.xlu0 %281 }
 0x136   :  { %922 = vrsqrt.f32 %v368_v12  ;;  %v348_v52 = vmul.f32 0.0051020407, %v278_v14  ;;  %v349_v27 = vmul.f32 0.0051020407, %v282_v45 }
 0x137   :  { %924 = vrsqrt.f32 %v369_v30 }
 0x138   :  { %v917_v4 = vpop.eup %916  ;;  %v370_v31 = vadd.f32 0.001, %v348_v52  ;;  %v371_v9 = vadd.f32 0.001, %v349_v27 }
 0x139   :  { %v286_v47 = vpop.xlane.xlu1 %285  ;;  %v290_v20 = vpop.xlane.xlu0 %289  ;;  %v1490_v15 = vmul.f32 %v917_v4, %v409_v46  ;;  %v418_v46 = vld [vmem:[%s1964_s1 + $0x48] sm:$0xff] }
 0x13a   :  { %926 = vrsqrt.f32 %v370_v31  ;;  %v350_v19 = vmul.f32 0.0051020407, %v286_v47  ;;  %v351_v11 = vmul.f32 0.0051020407, %v290_v20  ;;  %v414_v4 = vld [vmem:[%s1964_s1 + $0x28] sm:$0xff] }
 0x13b   :  { %522 = vperm.xlu0 %914, %v1490_v15  }
 0x13c   :  { %v919_v36 = vpop.eup %918  ;;  %v372_v43 = vadd.f32 0.001, %v350_v19  ;;  %v373_v37 = vadd.f32 0.001, %v351_v11  ;;  %v416_v11 = vld [vmem:[%s1964_s1 + $0x38] sm:$0xff] }
 0x13d   :  { %v294_v17 = vpop.xlane.xlu1 %293  ;;  %v298_v49 = vpop.xlane.xlu0 %297  ;;  %v1496_v59 = vmul.f32 %v919_v36, %v410_v16 }
 0x13e   :  { %v921_v61 = vpop.eup %920  ;;  %v352_v3 = vmul.f32 0.0051020407, %v294_v17  ;;  %v353_v35 = vmul.f32 0.0051020407, %v298_v49 }
 0x13f   :  { %527 = vperm.xlu1 %915, %v1496_v59   ;;  %v1502_v32 = vmul.f32 %v921_v61, %v411_v54  ;;  %v420_v61 = vld [vmem:[%s1964_s1 + $0x58] sm:$0xff] }
 0x140   :  { %v374_v40 = vadd.f32 0.001, %v352_v3  ;;  %v923_v55 = vpop.eup %922  ;;  %v375_v52 = vadd.f32 0.001, %v353_v35  ;;  %v415_v3 = vld [vmem:[%s1964_s1 + $0x30] sm:$0xff] }
 0x141   :  { %v302_v22 = vpop.xlane.xlu1 %301  ;;  %v306_v60 = vpop.xlane.xlu0 %305  ;;  %v1508_v44 = vmul.f32 %v923_v55, %v412_v10 }
 0x142   :  { %928 = vrsqrt.f32 %v374_v40  ;;  %v354_v38 = vmul.f32 0.0051020407, %v302_v22  ;;  %v925_v28 = vpop.eup %924  ;;  %v355_v47 = vmul.f32 0.0051020407, %v306_v60 }
 0x143   :  { %532 = vperm.xlu1 %915, %v1502_v32   ;;  %930 = vrsqrt.f32 %v371_v9  ;;  %v1514_v63 = vmul.f32 %v925_v28, %v413_v25 }
 0x144   :  { %v376_v21 = vadd.f32 0.001, %v354_v38  ;;  %v927_v14 = vpop.eup %926  ;;  %v377_v9 = vadd.f32 0.001, %v355_v47 }
 0x145   :  { %v310_v33 = vpop.xlane.xlu1 %309  ;;  %v314_v62 = vpop.xlane.xlu0 %313  ;;  %v1525_v27 = vmul.f32 %v927_v14, %v414_v4  ;;  %v424_v14 = vld [vmem:[%s1964_s1 + $0x78] sm:$0xff] }
 0x146   :  { %932 = vrsqrt.f32 %v376_v21  ;;  %v356_v23 = vmul.f32 0.0051020407, %v310_v33  ;;  %v357_v19 = vmul.f32 0.0051020407, %v314_v62 }
 0x147   :  { %537 = vperm.xlu1 %915, %v1508_v44   ;;  %934 = vrsqrt.f32 %v372_v43  ;;  %v422_v43 = vld [vmem:[%s1964_s1 + $0x68] sm:$0xff] }
 0x148   :  { %v378_v2 = vadd.f32 0.001, %v356_v23  ;;  %v379_v28 = vadd.f32 0.001, %v357_v19 }
 0x149   :  { %v318_v12 = vpop.xlane.xlu1 %317  ;;  %v322_v16 = vpop.xlane.xlu0 %321 }
 0x14a   :  { %936 = vrsqrt.f32 %v378_v2  ;;  %v358_v45 = vmul.f32 0.0051020407, %v318_v12  ;;  %v359_v23 = vmul.f32 0.0051020407, %v322_v16 }
 0x14b   :  { %542 = vperm.xlu1 %915, %v1514_v63   ;;  %938 = vrsqrt.f32 %v373_v37 }
 0x14c   :  { %v929_v30 = vpop.eup %928  ;;  %v380_v20 = vadd.f32 0.001, %v358_v45  ;;  %v417_v45 = vld [vmem:[%s1964_s1 + $0x40] sm:$0xff]  ;;  %v381_v4 = vadd.f32 0.001, %v359_v23  ;;  %v423_v23 = vld [vmem:[%s1964_s1 + $0x70] sm:$0xff] }
 0x14d   :  { %v326_v36 = vpop.xlane.xlu1 %325  ;;  %v1523_v31 = vmul.f32 %v929_v30, %v418_v46  ;;  %v931_v17 = vpop.eup %930 }
 0x14e   :  { %940 = vrsqrt.f32 %v380_v20  ;;  %v360_v49 = vmul.f32 0.0051020407, %v326_v36  ;;  %v1537_v55 = vmul.f32 %v931_v17, %v415_v3  ;;  %v330_v21 = vpop.xlane.xlu0 %329  ;;  %v426_v17 = vld [vmem:[%s1964_s1 + $0x88] sm:$0xff] }
 0x14f   :  { %567 = vperm.xlu0 %914, %v1523_v31   ;;  %547 = vperm.xlu1 %915, %v1525_v27   ;;  %942 = vrsqrt.f32 %v375_v52  ;;  %v361_v30 = vmul.f32 0.0051020407, %v330_v21 }
 0x150   :  { %v933_v54 = vpop.eup %932  ;;  %v382_v40 = vadd.f32 0.001, %v360_v49  ;;  %v419_v49 = vld [vmem:[%s1964_s1 + $0x50] sm:$0xff] }
 0x151   :  { %v334_v22 = vpop.xlane.xlu1 %333  ;;  %v1535_v60 = vmul.f32 %v933_v54, %v420_v61  ;;  %v935_v38 = vpop.eup %934  ;;  %v383_v3 = vadd.f32 0.001, %v361_v30 }
 0x152   :  { %944 = vrsqrt.f32 %v382_v40  ;;  %v362_v10 = vmul.f32 0.0051020407, %v334_v22  ;;  %v1549_v35 = vmul.f32 %v935_v38, %v416_v11  ;;  %v338_v47 = vpop.xlane.xlu0 %337  ;;  %v428_v22 = vld [vmem:[%s1964_s1 + $0x98] sm:$0xff]  ;;  %v421_v38 = vld [vmem:[%s1964_s1 + $0x60] sm:$0xff] }
 0x153   :  { %577 = vperm.xlu0 %914, %v1535_v60   ;;  %552 = vperm.xlu1 %915, %v1537_v55   ;;  %946 = vrsqrt.f32 %v377_v9  ;;  %v363_v54 = vmul.f32 0.0051020407, %v338_v47  ;;  %v427_v47 = vld [vmem:[%s1964_s1 + $0x90] sm:$0xff] }
 0x154   :  { %v937_v33 = vpop.eup %936  ;;  %v384_v25 = vadd.f32 0.001, %v362_v10 }
 0x155   :  { %v342_v62 = vpop.xlane.xlu1 %341  ;;  %v1547_v37 = vmul.f32 %v937_v33, %v422_v43  ;;  %v939_v2 = vpop.eup %938  ;;  %v385_v43 = vadd.f32 0.001, %v363_v54 }
 0x156   :  { %948 = vrsqrt.f32 %v384_v25  ;;  %v364_v12 = vmul.f32 0.0051020407, %v342_v62  ;;  %v1561_v16 = vmul.f32 %v939_v2, %v417_v45  ;;  %v889_v45 = vld [vmem:[%s1964_s1 + $0xb8] sm:$0xff] }
 0x157   :  { %587 = vperm.xlu0 %914, %v1547_v37   ;;  %557 = vperm.xlu1 %915, %v1549_v35   ;;  %950 = vrsqrt.f32 %v379_v28  ;;  %v430_v28 = vld [vmem:[%s1964_s1 + $0xa8] sm:$0xff] }
 0x158   :  { %v941_v46 = vpop.eup %940  ;;  %v386_v52 = vadd.f32 0.001, %v364_v12  ;;  %v477_v12 = vmul.f32 %v1496_v59, %v1345_v13  ;;  %v891_v59 = vld [vmem:[%s1964_s1 + $0xc8] sm:$0xff] }
 0x159   :  { %v1559_v20 = vmul.f32 %v941_v46, %v424_v14  ;;  %v943_v36 = vpop.eup %942  ;;  %v425_v46 = vld [vmem:[%s1964_s1 + $0x80] sm:$0xff] }
 0x15a   :  { %952 = vrsqrt.f32 %v386_v52  ;;  %v1573_v19 = vmul.f32 %v943_v36, %v419_v49  ;;  %v479_v52 = vmul.f32 %v1508_v44, %v1347_v29  ;;  %v481_v49 = vmul.f32 %v1525_v27, %v1361_v5  ;;  %v893_v29 = vld [vmem:[%s1964_s1 + $0xd8] sm:$0xff]  ;;  %v429_v44 = vld [vmem:[%s1964_s1 + $0xa0] sm:$0xff]  ;;  %v895_v27 = vld [vmem:[%s1964_s1 + $0xe8] sm:$0xff] }
 0x15b   :  { %597 = vperm.xlu0 %914, %v1559_v20   ;;  %562 = vperm.xlu1 %915, %v1561_v16   ;;  %954 = vrsqrt.f32 %v381_v4  ;;  %v499_v4 = vsub.f32 %v889_v45, %v477_v12  ;;  %v476_v5 = vmul.f32 %v1490_v15, %v1333_v53  ;;  %v897_v53 = vld [vmem:[%s1964_s1 + $0xf8] sm:$0xff]  ;;  %v890_v15 = vld [vmem:[%s1964_s1 + $0xc0] sm:$0xff] }
 0x15c   :  { %v945_v61 = vpop.eup %944  ;;  %956 = vrsqrt.f32 %v383_v3  ;;  %v501_v36 = vsub.f32 %v891_v59, %v479_v52  ;;  %v503_v3 = vsub.f32 %v893_v29, %v481_v49 }
 0x15d   :  { %v1571_v9 = vmul.f32 %v945_v61, %v426_v17  ;;  %v947_v40 = vpop.eup %946  ;;  %958 = vrsqrt.f32 %v385_v43  ;;  %v485_v43 = vmul.f32 %v1523_v31, %v1389_v26  ;;  %v480_v26 = vmul.f32 %v1514_v63, %v1359_v51  ;;  %v901_v51 = vld [vmem:[%s1964_s1 + $0x118] sm:$0xff]  ;;  %v894_v63 = vld [vmem:[%s1964_s1 + $0xe0] sm:$0xff] }
 0x15e   :  { %v1585_v21 = vmul.f32 %v947_v40, %v421_v38  ;;  %v483_v40 = vmul.f32 %v1549_v35, %v1375_v18  ;;  %v478_v18 = vmul.f32 %v1502_v32, %v1335_v57  ;;  %v899_v57 = vld [vmem:[%s1964_s1 + $0x108] sm:$0xff]  ;;  %v892_v32 = vld [vmem:[%s1964_s1 + $0xd0] sm:$0xff] }
 0x15f   :  { %607 = vperm.xlu0 %914, %v1571_v9   ;;  %572 = vperm.xlu1 %915, %v1573_v19   ;;  %v507_v35 = vsub.f32 %v897_v53, %v485_v43 }
 0x160   :  { %v949_v10 = vpop.eup %948  ;;  %v505_v38 = vsub.f32 %v895_v27, %v483_v40 }
 0x161   :  { %v1583_v11 = vmul.f32 %v949_v10, %v428_v22  ;;  %v951_v33 = vpop.eup %950  ;;  %v888_v22 = vld [vmem:[%s1964_s1 + $0xb0] sm:$0xff] }
 0x162   :  { %v1597_v2 = vmul.f32 %v951_v33, %v423_v23  ;;  %v498_v10 = vsub.f32 %v888_v22, %v476_v5  ;;  %v500_v33 = vsub.f32 %v890_v15, %v478_v18  ;;  %v502_v23 = vsub.f32 %v892_v32, %v480_v26 }
 0x163   :  { %617 = vperm.xlu0 %914, %v1583_v11   ;;  %582 = vperm.xlu1 %915, %v1585_v21   ;;  %v495_v52 = vmul.f32 %v1583_v11, %v1459_v8  ;;  %v902_v11 = vld [vmem:[%s1964_s1 + $0x120] sm:$0xff] }
 0x164   :  { %v953_v25 = vpop.eup %952  ;;  %v490_v8 = vmul.f32 %v1597_v2, %v1429_v1 }
 0x165   :  { %v1595_v62 = vmul.f32 %v953_v25, %v430_v28  ;;  %v955_v14 = vpop.eup %954  ;;  %v487_v28 = vmul.f32 %v1535_v60, %v1403_v34  ;;  %v489_v25 = vmul.f32 %v1547_v37, %v1417_v42  ;;  %v482_v34 = vmul.f32 %v1537_v55, %v1373_v0  ;;  %v903_v0 = vld [vmem:[%s1964_s1 + $0x128] sm:$0xff]  ;;  %v896_v55 = vld [vmem:[%s1964_s1 + $0xf0] sm:$0xff] }
 0x166   :  { %v1609_v30 = vmul.f32 %v955_v14, %v425_v46  ;;  %v957_v13 = vpop.eup %956  ;;  %v491_v14 = vmul.f32 %v1559_v20, %v1431_v50  ;;  %v484_v42 = vmul.f32 %v1561_v16, %v1387_v6  ;;  %v493_v46 = vmul.f32 %v1571_v9, %v1445_v58  ;;  %v905_v6 = vld [vmem:[%s1964_s1 + $0x138] sm:$0xff]  ;;  %v898_v20 = vld [vmem:[%s1964_s1 + $0x100] sm:$0xff]  ;;  %v900_v9 = vld [vmem:[%s1964_s1 + $0x110] sm:$0xff] }
 0x167   :  { %627 = vperm.xlu0 %914, %v1595_v62   ;;  %592 = vperm.xlu1 %915, %v1597_v2   ;;  %v1620_v17 = vmul.f32 %v957_v13, %v427_v47  ;;  %v959_v61 = vpop.eup %958  ;;  %v509_v31 = vsub.f32 %v899_v57, %v487_v28  ;;  %v511_v60 = vsub.f32 %v901_v51, %v489_v25  ;;  %v906_v2 = vld [vmem:[%s1964_s1 + $0x140] sm:$0xff]  ;;  %v960_v28 = vld [vmem:[%s1963_s0 + $0x10] sm:$0xff]  ;;  %v961_v57 = vld [vmem:[%s1963_s0 + $0x18] sm:$0xff] }
 0x168   :  { %v1631_v54 = vmul.f32 %v959_v61, %v429_v44  ;;  %v504_v12 = vsub.f32 %v894_v63, %v482_v34  ;;  %v513_v37 = vsub.f32 %v903_v0, %v491_v14  ;;  %v506_v45 = vsub.f32 %v896_v55, %v484_v42  ;;  %v962_v51 = vld [vmem:[%s1963_s0 + $0x30] sm:$0xff] }
 0x169   :  { %v486_v50 = vmul.f32 %v1573_v19, %v1401_v41  ;;  %v515_v16 = vsub.f32 %v905_v6, %v493_v46  ;;  %v488_v58 = vmul.f32 %v1585_v21, %v1415_v7  ;;  %v907_v41 = vld [vmem:[%s1964_s1 + $0x148] sm:$0xff]  ;;  %v497_v59 = vmul.f32 %v1595_v62, %v1473_v24  ;;  %v909_v7 = vld [vmem:[%s1964_s1 + $0x158] sm:$0xff]  ;;  %v904_v24 = vld [vmem:[%s1964_s1 + $0x130] sm:$0xff] }
 0x16a   :  { %v517_v19 = vsub.f32 %v907_v41, %v495_v52  ;;  %v512_v47 = vsub.f32 %v902_v11, %v490_v8  ;;  %v494_v62 = vmul.f32 %v1620_v17, %v1457_v39  ;;  %v496_v61 = vmul.f32 %v1631_v54, %v1471_v48  ;;  %v965_v46 = vld [vmem:[%s1963_s0 + $0x58] sm:$0xff]  ;;  %v966_v52 = vld [vmem:[%s1963_s0] sm:$0xff]  ;;  %v967_v41 = vld [vmem:[%s1963_s0 + $0x8] sm:$0xff] }
 0x16b   :  { %681 = vperm.xlu0 %914, %v499_v4   ;;  %602 = vperm.xlu1 %915, %v1609_v30   ;;  %v508_v4 = vsub.f32 %v898_v20, %v486_v50  ;;  %v510_v13 = vsub.f32 %v900_v9, %v488_v58  ;;  %v519_v21 = vsub.f32 %v909_v7, %v497_v59  ;;  %v969_v59 = vld [vmem:[%s1963_s0 + $0x78] sm:$0xff] }
 0x16c   :  { %v516_v49 = vsub.f32 %v906_v2, %v494_v62  ;;  %v971_v2 = vld [vmem:[%s1963_s0 + $0x28] sm:$0xff] }
 0x16f   :  { %691 = vperm.xlu0 %914, %v501_v36   ;;  %612 = vperm.xlu1 %915, %v1620_v17   ;;  %v492_v36 = vmul.f32 %v1609_v30, %v1443_v56  ;;  %v908_v56 = vld [vmem:[%s1964_s1 + $0x150] sm:$0xff] }
 0x170   :  { %v518_v30 = vsub.f32 %v908_v56, %v496_v61  ;;  %v972_v61 = vld [vmem:[%s1963_s0 + $0x90] sm:$0xff] }
 0x171   :  { %v514_v1 = vsub.f32 %v904_v24, %v492_v36 }
 0x173   :  { %701 = vperm.xlu0 %914, %v503_v3   ;;  %622 = vperm.xlu1 %915, %v1631_v54  }
 0x177   :  { %711 = vperm.xlu0 %914, %v505_v38   ;;  %676 = vperm.xlu1 %915, %v498_v10  }
 0x17b   :  { %721 = vperm.xlu0 %914, %v507_v35   ;;  %686 = vperm.xlu1 %915, %v500_v33  }
 0x17f   :  { %731 = vperm.xlu0 %914, %v509_v31   ;;  %696 = vperm.xlu1 %915, %v502_v23  }
 0x183   :  { %741 = vperm.xlu0 %914, %v511_v60   ;;  %706 = vperm.xlu1 %915, %v504_v12   ;;  %v963_v60 = vld [vmem:[%s1963_s0 + $0x38] sm:$0xff] }
 0x187   :  { %751 = vperm.xlu0 %914, %v513_v37   ;;  %716 = vperm.xlu1 %915, %v506_v45   ;;  %v964_v37 = vld [vmem:[%s1963_s0 + $0x50] sm:$0xff] }
 0x18b   :  { %761 = vperm.xlu0 %914, %v515_v16   ;;  %726 = vperm.xlu1 %915, %v508_v4  }
 0x18f   :  { %771 = vperm.xlu0 %914, %v517_v19   ;;  %736 = vperm.xlu1 %915, %v510_v13   ;;  %v968_v19 = vld [vmem:[%s1963_s0 + $0x70] sm:$0xff] }
 0x193   :  { %781 = vperm.xlu0 %914, %v519_v21   ;;  %746 = vperm.xlu1 %915, %v512_v47  }
 0x197   :  { %756 = vperm.xlu1 %915, %v514_v1   ;;  %v970_v1 = vld [vmem:[%s1963_s0 + $0x20] sm:$0xff] }
 0x19b   :  { %766 = vperm.xlu1 %915, %v516_v49  }
 0x19f   :  { %776 = vperm.xlu1 %915, %v518_v30   ;;  %v973_v30 = vld [vmem:[%s1963_s0 + $0x98] sm:$0xff] }
 0x1ba   :  { %v523_v17 = vpop.permute.xlu0 %522 }
 0x1bb   :  { %v630_v58 = vmul.f32 %v966_v52, %v523_v17  ;;  %v631_v9 = vmul.f32 %v967_v41, %v523_v17 }
 0x1be   :  { %v528_v29 = vpop.permute.xlu1 %527 }
 0x1bf   :  { %v632_v26 = vmul.f32 %v960_v28, %v528_v29  ;;  %v633_v32 = vmul.f32 %v961_v57, %v528_v29 }
 0x1c2   :  { %v1729_v44 = vpop.permute.xlu1 %532 }
 0x1c3   :  { %v634_v62 = vmul.f32 %v970_v1, %v1729_v44  ;;  %v635_v49 = vmul.f32 %v971_v2, %v1729_v44  ;;  %v986_v2 = vld [vmem:[%s1963_s0 + $0xa0] sm:$0xff] }
 0x1c6   :  { %v538_v39 = vpop.permute.xlu1 %537 }
 0x1c7   :  { %v636_v63 = vmul.f32 %v962_v51, %v538_v39  ;;  %v637_v12 = vmul.f32 %v963_v60, %v538_v39 }
 0x1ca   :  { %v1731_v3 = vpop.permute.xlu1 %542 }
 0x1ce   :  { %v548_v40 = vpop.permute.xlu1 %547  ;;  %v1733_v5 = vpop.permute.xlu0 %567 }
 0x1cf   :  { %v640_v45 = vmul.f32 %v964_v37, %v548_v40  ;;  %v641_v50 = vmul.f32 %v965_v46, %v548_v40  ;;  %v648_v56 = vmul.f32 %v972_v61, %v1733_v5  ;;  %v649_v29 = vmul.f32 %v973_v30, %v1733_v5  ;;  %v975_v5 = vld [vmem:[%s1963_s0 + $0x48] sm:$0xff]  ;;  %v980_v46 = vld [vmem:[%s1963_s0 + $0xd0] sm:$0xff] }
 0x1d2   :  { %v1735_v27 = vpop.permute.xlu1 %552  ;;  %v1737_v48 = vpop.permute.xlu0 %577 }
 0x1d6   :  { %v558_v54 = vpop.permute.xlu1 %557  ;;  %v1739_v22 = vpop.permute.xlu0 %587 }
 0x1d7   :  { %v644_v13 = vmul.f32 %v968_v19, %v558_v54  ;;  %v645_v8 = vmul.f32 %v969_v59, %v558_v54  ;;  %v982_v19 = vld [vmem:[%s1963_s0 + $0x80] sm:$0xff] }
 0x1da   :  { %v1741_v38 = vpop.permute.xlu1 %562  ;;  %v1743_v10 = vpop.permute.xlu0 %597 }
 0x1de   :  { %v1745_v43 = vpop.permute.xlu1 %572  ;;  %v1747_v18 = vpop.permute.xlu0 %607 }
 0x1e2   :  { %v1749_v53 = vpop.permute.xlu1 %582  ;;  %v1751_v15 = vpop.permute.xlu0 %617 }
 0x1e6   :  { %v1753_v35 = vpop.permute.xlu1 %592  ;;  %v1755_v33 = vpop.permute.xlu0 %627 }
 0x1ea   :  { %v1763_v31 = vpop.permute.xlu1 %602  ;;  %v682_v23 = vpop.permute.xlu0 %681 }
 0x1eb   :  { %v786_v25 = vadd.f32 %v682_v23, %v632_v26  ;;  %v787_v34 = vadd.f32 %v682_v23, %v633_v32  ;;  %v974_v26 = vld [vmem:[%s1963_s0 + $0x40] sm:$0xff]  ;;  %v639_v32 = vmul.f32 %v975_v5, %v1731_v3  ;;  %v976_v23 = vld [vmem:[%s1963_s0 + $0xb0] sm:$0xff] }
 0x1ec   :  { %v638_v57 = vmul.f32 %v974_v26, %v1731_v3  ;;  %v990_v26 = vld [vmem:[%s1963_s0 + $0xc0] sm:$0xff] }
 0x1ed   :  { %830 = vst [vmem:[#allocation2 + $0x10] sm:$0xff] %v786_v25  ;;  %831 = vst.msk [vmem:[#allocation2 + $0x18] sm:$0xff] %vm56_vm0, %v787_v34  ;;  %v652_v25 = vmul.f32 %v976_v23, %v1737_v48  ;;  %v977_v34 = vld [vmem:[%s1963_s0 + $0xb8] sm:$0xff] }
 0x1ee   :  { %v1772_v14 = vpop.permute.xlu1 %612  ;;  %v692_v42 = vpop.permute.xlu0 %691  ;;  %v653_v51 = vmul.f32 %v977_v34, %v1737_v48  ;;  %v979_v48 = vld [vmem:[%s1963_s0 + $0x68] sm:$0xff] }
 0x1ef   :  { %v790_v0 = vadd.f32 %v692_v42, %v636_v63  ;;  %v791_v55 = vadd.f32 %v692_v42, %v637_v12 }
 0x1f1   :  { %834 = vst [vmem:[#allocation2 + $0x30] sm:$0xff] %v790_v0  ;;  %835 = vst.msk [vmem:[#allocation2 + $0x38] sm:$0xff] %vm56_vm0, %v791_v55  ;;  %v978_v55 = vld [vmem:[%s1963_s0 + $0x60] sm:$0xff] }
 0x1f2   :  { %v1781_v6 = vpop.permute.xlu1 %622  ;;  %v702_v20 = vpop.permute.xlu0 %701  ;;  %v642_v37 = vmul.f32 %v978_v55, %v1735_v27 }
 0x1f3   :  { %v794_v16 = vadd.f32 %v702_v20, %v640_v45  ;;  %v795_v4 = vadd.f32 %v702_v20, %v641_v50  ;;  %v643_v45 = vmul.f32 %v979_v48, %v1735_v27  ;;  %v656_v50 = vmul.f32 %v980_v46, %v1739_v22  ;;  %v981_v20 = vld [vmem:[%s1963_s0 + $0xd8] sm:$0xff] }
 0x1f5   :  { %838 = vst [vmem:[#allocation2 + $0x50] sm:$0xff] %v794_v16  ;;  %839 = vst.msk [vmem:[#allocation2 + $0x58] sm:$0xff] %vm56_vm0, %v795_v4  ;;  %v657_v16 = vmul.f32 %v981_v20, %v1739_v22  ;;  %v983_v22 = vld [vmem:[%s1963_s0 + $0x88] sm:$0xff] }
 0x1f6   :  { %v677_v7 = vpop.permute.xlu1 %676  ;;  %v712_v11 = vpop.permute.xlu0 %711  ;;  %v647_v59 = vmul.f32 %v983_v22, %v1741_v38  ;;  %v1000_v22 = vld [vmem:[%s1963_s0 + $0x120] sm:$0xff] }
 0x1f7   :  { %v784_v21 = vadd.f32 %v677_v7, %v630_v58  ;;  %v785_v47 = vadd.f32 %v677_v7, %v631_v9  ;;  %v798_v36 = vadd.f32 %v712_v11, %v644_v13  ;;  %v799_v24 = vadd.f32 %v712_v11, %v645_v8  ;;  %v984_v8 = vld [vmem:[%s1963_s0 + $0xf0] sm:$0xff]  ;;  %v985_v11 = vld [vmem:[%s1963_s0 + $0xf8] sm:$0xff] }
 0x1f8   :  { %v646_v13 = vmul.f32 %v982_v19, %v1741_v38  ;;  %v660_v7 = vmul.f32 %v984_v8, %v1743_v10  ;;  %v1001_v8 = vld [vmem:[%s1963_s0 + $0x128] sm:$0xff] }
 0x1f9   :  { %828 = vst [vmem:[#allocation2] sm:$0xff] %v784_v21  ;;  %829 = vst.msk [vmem:[#allocation2 + $0x8] sm:$0xff] %vm56_vm0, %v785_v47  ;;  %v661_v21 = vmul.f32 %v985_v11, %v1743_v10  ;;  %v987_v10 = vld [vmem:[%s1963_s0 + $0xa8] sm:$0xff] }
 0x1fa   :  { %842 = vst [vmem:[#allocation2 + $0x70] sm:$0xff] %v798_v36  ;;  %843 = vst.msk [vmem:[#allocation2 + $0x78] sm:$0xff] %vm56_vm0, %v799_v24  ;;  %v687_v39 = vpop.permute.xlu1 %686  ;;  %v722_v44 = vpop.permute.xlu0 %721  ;;  %v651_v61 = vmul.f32 %v987_v10, %v1745_v43 }
 0x1fb   :  { %v788_v17 = vadd.f32 %v687_v39, %v634_v62  ;;  %v789_v40 = vadd.f32 %v687_v39, %v635_v49  ;;  %v802_v54 = vadd.f32 %v722_v44, %v648_v56  ;;  %v803_v28 = vadd.f32 %v722_v44, %v649_v29  ;;  %v988_v56 = vld [vmem:[%s1963_s0 + $0x110] sm:$0xff]  ;;  %v989_v29 = vld [vmem:[%s1963_s0 + $0x118] sm:$0xff] }
 0x1fc   :  { %v650_v49 = vmul.f32 %v986_v2, %v1745_v43  ;;  %v664_v30 = vmul.f32 %v988_v56, %v1747_v18  ;;  %v665_v39 = vmul.f32 %v989_v29, %v1747_v18  ;;  %v991_v18 = vld [vmem:[%s1963_s0 + $0xc8] sm:$0xff] }
 0x1fd   :  { %832 = vst [vmem:[#allocation2 + $0x20] sm:$0xff] %v788_v17  ;;  %833 = vst.msk [vmem:[#allocation2 + $0x28] sm:$0xff] %vm56_vm0, %v789_v40  ;;  %v655_v5 = vmul.f32 %v991_v18, %v1749_v53 }
 0x1fe   :  { %846 = vst [vmem:[#allocation2 + $0x90] sm:$0xff] %v802_v54  ;;  %847 = vst.msk [vmem:[#allocation2 + $0x98] sm:$0xff] %vm56_vm0, %v803_v28  ;;  %v697_v63 = vpop.permute.xlu1 %696  ;;  %v732_v3 = vpop.permute.xlu0 %731 }
 0x1ff   :  { %v792_v60 = vadd.f32 %v697_v63, %v638_v57  ;;  %v793_v12 = vadd.f32 %v697_v63, %v639_v32  ;;  %v806_v42 = vadd.f32 %v732_v3, %v652_v25  ;;  %v807_v0 = vadd.f32 %v732_v3, %v653_v51  ;;  %v992_v32 = vld [vmem:[%s1963_s0 + $0x130] sm:$0xff]  ;;  %v993_v25 = vld [vmem:[%s1963_s0 + $0x138] sm:$0xff] }
 0x200   :  { %v654_v57 = vmul.f32 %v990_v26, %v1749_v53  ;;  %v668_v23 = vmul.f32 %v992_v32, %v1751_v15  ;;  %v669_v34 = vmul.f32 %v993_v25, %v1751_v15  ;;  %v995_v15 = vld [vmem:[%s1963_s0 + $0xe8] sm:$0xff] }
 0x201   :  { %836 = vst [vmem:[#allocation2 + $0x40] sm:$0xff] %v792_v60  ;;  %837 = vst.msk [vmem:[#allocation2 + $0x48] sm:$0xff] %vm56_vm0, %v793_v12  ;;  %v659_v55 = vmul.f32 %v995_v15, %v1753_v35 }
 0x202   :  { %850 = vst [vmem:[#allocation2 + $0xb0] sm:$0xff] %v806_v42  ;;  %851 = vst.msk [vmem:[#allocation2 + $0xb8] sm:$0xff] %vm56_vm0, %v807_v0  ;;  %v707_v4 = vpop.permute.xlu1 %706  ;;  %v742_v27 = vpop.permute.xlu0 %741  ;;  %v994_v42 = vld [vmem:[%s1963_s0 + $0xe0] sm:$0xff] }
 0x203   :  { %v796_v52 = vadd.f32 %v707_v4, %v642_v37  ;;  %v797_v58 = vadd.f32 %v707_v4, %v643_v45  ;;  %v810_v41 = vadd.f32 %v742_v27, %v656_v50  ;;  %v811_v9 = vadd.f32 %v742_v27, %v657_v16  ;;  %v996_v37 = vld [vmem:[%s1963_s0 + $0x150] sm:$0xff]  ;;  %v997_v45 = vld [vmem:[%s1963_s0 + $0x158] sm:$0xff] }
 0x204   :  { %v658_v0 = vmul.f32 %v994_v42, %v1753_v35  ;;  %v672_v48 = vmul.f32 %v996_v37, %v1755_v33  ;;  %v673_v46 = vmul.f32 %v997_v45, %v1755_v33  ;;  %v999_v33 = vld [vmem:[%s1963_s0 + $0x108] sm:$0xff] }
 0x205   :  { %840 = vst [vmem:[#allocation2 + $0x60] sm:$0xff] %v796_v52  ;;  %841 = vst.msk [vmem:[#allocation2 + $0x68] sm:$0xff] %vm56_vm0, %v797_v58  ;;  %v998_v52 = vld [vmem:[%s1963_s0 + $0x100] sm:$0xff] }
 0x206   :  { %854 = vst [vmem:[#allocation2 + $0xd0] sm:$0xff] %v810_v41  ;;  %855 = vst.msk [vmem:[#allocation2 + $0xd8] sm:$0xff] %vm56_vm0, %v811_v9  ;;  %v717_v47 = vpop.permute.xlu1 %716  ;;  %v752_v38 = vpop.permute.xlu0 %751  ;;  %v662_v58 = vmul.f32 %v998_v52, %v1763_v31  ;;  %v663_v41 = vmul.f32 %v999_v33, %v1763_v31  ;;  %v667_v31 = vmul.f32 %v1001_v8, %v1772_v14 }
 0x207   :  { %v800_v36 = vadd.f32 %v717_v47, %v646_v13  ;;  %v801_v24 = vadd.f32 %v717_v47, %v647_v59  ;;  %v814_v1 = vadd.f32 %v752_v38, %v660_v7  ;;  %v815_v62 = vadd.f32 %v752_v38, %v661_v21  ;;  %v1002_v47 = vld [vmem:[%s1963_s0 + $0x140] sm:$0xff] }
 0x208   :  { %v666_v59 = vmul.f32 %v1000_v22, %v1772_v14  ;;  %v670_v38 = vmul.f32 %v1002_v47, %v1781_v6 }
 0x209   :  { %844 = vst [vmem:[#allocation2 + $0x80] sm:$0xff] %v800_v36  ;;  %845 = vst.msk [vmem:[#allocation2 + $0x88] sm:$0xff] %vm56_vm0, %v801_v24  ;;  %v1003_v36 = vld [vmem:[%s1963_s0 + $0x148] sm:$0xff] }
 0x20a   :  { %858 = vst [vmem:[#allocation2 + $0xf0] sm:$0xff] %v814_v1  ;;  %859 = vst.msk [vmem:[#allocation2 + $0xf8] sm:$0xff] %vm56_vm0, %v815_v62  ;;  %v727_v44 = vpop.permute.xlu1 %726  ;;  %v762_v43 = vpop.permute.xlu0 %761  ;;  %v671_v14 = vmul.f32 %v1003_v36, %v1781_v6 }
 0x20b   :  { %v804_v17 = vadd.f32 %v727_v44, %v650_v49  ;;  %v805_v40 = vadd.f32 %v727_v44, %v651_v61  ;;  %v818_v54 = vadd.f32 %v762_v43, %v664_v30  ;;  %v819_v28 = vadd.f32 %v762_v43, %v665_v39 }
 0x20d   :  { %848 = vst [vmem:[#allocation2 + $0xa0] sm:$0xff] %v804_v17  ;;  %849 = vst.msk [vmem:[#allocation2 + $0xa8] sm:$0xff] %vm56_vm0, %v805_v40 }
 0x20e   :  { %862 = vst [vmem:[#allocation2 + $0x110] sm:$0xff] %v818_v54  ;;  %863 = vst.msk [vmem:[#allocation2 + $0x118] sm:$0xff] %vm56_vm0, %v819_v28  ;;  %v737_v51 = vpop.permute.xlu1 %736  ;;  %v772_v53 = vpop.permute.xlu0 %771 }
 0x20f   :  { %v808_v63 = vadd.f32 %v737_v51, %v654_v57  ;;  %v809_v3 = vadd.f32 %v737_v51, %v655_v5  ;;  %v822_v60 = vadd.f32 %v772_v53, %v668_v23  ;;  %v823_v12 = vadd.f32 %v772_v53, %v669_v34 }
 0x211   :  { %852 = vst [vmem:[#allocation2 + $0xc0] sm:$0xff] %v808_v63  ;;  %853 = vst.msk [vmem:[#allocation2 + $0xc8] sm:$0xff] %vm56_vm0, %v809_v3 }
 0x212   :  { %866 = vst [vmem:[#allocation2 + $0x130] sm:$0xff] %v822_v60  ;;  %867 = vst.msk [vmem:[#allocation2 + $0x138] sm:$0xff] %vm56_vm0, %v823_v12  ;;  %v747_v50 = vpop.permute.xlu1 %746  ;;  %v782_v35 = vpop.permute.xlu0 %781 }
 0x213   :  { %v812_v20 = vadd.f32 %v747_v50, %v658_v0  ;;  %v813_v16 = vadd.f32 %v747_v50, %v659_v55  ;;  %v826_v4 = vadd.f32 %v782_v35, %v672_v48  ;;  %v827_v27 = vadd.f32 %v782_v35, %v673_v46 }
 0x215   :  { %856 = vst [vmem:[#allocation2 + $0xe0] sm:$0xff] %v812_v20  ;;  %857 = vst.msk [vmem:[#allocation2 + $0xe8] sm:$0xff] %vm56_vm0, %v813_v16 }
 0x216   :  { %870 = vst [vmem:[#allocation2 + $0x150] sm:$0xff] %v826_v4  ;;  %871 = vst.msk [vmem:[#allocation2 + $0x158] sm:$0xff] %vm56_vm0, %v827_v27  ;;  %v757_v9 = vpop.permute.xlu1 %756 }
 0x217   :  { %v816_v19 = vadd.f32 %v757_v9, %v662_v58  ;;  %v817_v13 = vadd.f32 %v757_v9, %v663_v41 }
 0x219   :  { %860 = vst [vmem:[#allocation2 + $0x100] sm:$0xff] %v816_v19  ;;  %861 = vst.msk [vmem:[#allocation2 + $0x108] sm:$0xff] %vm56_vm0, %v817_v13 }
 0x21a   :  { %v767_v7 = vpop.permute.xlu1 %766 }
 0x21b   :  { %v820_v11 = vadd.f32 %v767_v7, %v666_v59  ;;  %v821_v21 = vadd.f32 %v767_v7, %v667_v31 }
 0x21d   :  { %864 = vst [vmem:[#allocation2 + $0x120] sm:$0xff] %v820_v11  ;;  %865 = vst.msk [vmem:[#allocation2 + $0x128] sm:$0xff] %vm56_vm0, %v821_v21 }
 0x21e   :  { %v777_v24 = vpop.permute.xlu1 %776 }
 0x21f   :  { %v824_v1 = vadd.f32 %v777_v24, %v670_v38  ;;  %v825_v62 = vadd.f32 %v777_v24, %v671_v14 }
 0x221   :  { %868 = vst [vmem:[#allocation2 + $0x140] sm:$0xff] %v824_v1  ;;  %869 = vst.msk [vmem:[#allocation2 + $0x148] sm:$0xff] %vm56_vm0, %v825_v62 }
 0x222   :  { %1015 = shalt.err (!%p1012_p4)
}
 0x223   :  { %s1016_s21 = scalar_lea.hbm %s1965_s2, 5632 }
 0x224   :  { %p1017_p5 = scmp.ne.s32.totalorder %s1965_s2, %s1016_s21  ;;  %p1020_p6 = scmp.lt.u32.totalorder %s1016_s21, %s1965_s2 }
 0x226   :  { %p1022_p7 = pnand %p1020_p6, %p1017_p5 }
 0x228   :  { %1025 = shalt.err (!%p1022_p7)
}
 0x229   :  { %s1030_s26 = smov 256   ;;  %s1031_s27 = smov 16  }
 0x22a   :  { %883 = dma.vmem_to_hbm [thread:$0]  %s878_s15, 5632, %s1965_s2, [#allocation3], %s1030_s26, %s1030_s26, %s1031_s27  }
 0x22b   :  { %1026 = dma.done.wait [#allocation3], 5632  }
 0x22c   :  { %1027 = vsyncadd [#allocation3], 4294961664 }
 0x22d   :  { %887 = vsyncpa [#allocation3], 1 }

</bundles_post_ra>
